<compile_context>
chip_gen: v7x
topology: tpu7x:2x2x1
jax: 0.10.0
libtpu: 0.0.40
codegen_flags: <defaults>
</compile_context>

<pallas_src>
import jax
import jax.numpy as jnp
from jax.experimental import pallas as pl
from jax.experimental.pallas import tpu as pltpu


def _normalize_kernel(scale_ref, bias_ref, x_ref, o_ref):
    # scale_ref / bias_ref: (TR, 1) f32 per-row channel stats (lane-broadcast
    # is free on the VPU).  x_ref: (TR, TL) tile in the INPUT dtype; cast to
    # f32 in-register, FMA, store as the output dtype.
    x = x_ref[...].astype(jnp.float32)
    o_ref[...] = (x * scale_ref[...] + bias_ref[...]).astype(o_ref.dtype)


def _device_kind():
    try:
        return jax.devices()[0].device_kind.lower()
    except Exception:
        return ""


def _tile_budget():
    """Per-generation (tile byte budget, explicit vmem_limit_bytes or None)."""
    kind = _device_kind()
    if "v7" in kind:
        # v7x: ~3.2 TB/s HBM makes per-step overhead loom larger -> bigger
        # tiles.  2 in + 2 out double-buffered 6 MiB slabs = 24 MiB; set the
        # scoped limit explicitly, well under the 64 MiB physical VMEM.
        return 6 * 1024 * 1024, 40 * 1024 * 1024
    if "v6" in kind:
        # v6e default scoped limit is 32 MiB; 4 x 4 MiB fits with headroom.
        return 4 * 1024 * 1024, None
    # v5e (16 MiB default scoped VMEM) / unknown: conservative.
    return 3 * 1024 * 1024, None


def _choose_row_tile(rows, max_tile=256):
    # Full extent (always legal) when small, else a multiple of 8.
    return rows if rows <= max_tile else max_tile


def _choose_col_tile(cols, row_tile, tile_bytes, elem_bytes=4):
    # Size the lane (column) tile from a byte budget; multiple of 128 or full
    # extent, floor 512 lanes to keep stores lane-dense and unmasked.
    if cols * row_tile * elem_bytes <= tile_bytes:
        return cols
    tl = (tile_bytes // (elem_bytes * row_tile)) // 128 * 128
    tl = max(tl, 512)
    return min(tl, cols)


def normalize(x, mean, std, *, donate_input=False):
    """(x - mean) / std with per-channel mean/std, NCHW layout.

    Mirrors the PyTorch module: if len(mean) > 1 the stats are per-channel
    (reshape(1, C, 1, 1)); otherwise the single scalar broadcasts everywhere.
    The input is consumed in its native dtype (cast happens in-kernel); the
    output is float32, matching torch promotion against float32 buffers.
    """
    x = jnp.asarray(x)
    mean = jnp.asarray(mean, jnp.float32).reshape(-1)
    std = jnp.asarray(std, jnp.float32).reshape(-1)

    N, C, H, W = x.shape
    if mean.shape[0] == 1:
        mean = jnp.broadcast_to(mean, (C,))
        std = jnp.broadcast_to(std, (C,))
    assert mean.shape[0] == C and std.shape[0] == C

    out_dtype = jnp.float32
    # Affine form: (x - m) / s == x * (1/s) + (-m/s)   (~1 ulp vs exact divide)
    scale_c = (1.0 / std).astype(jnp.float32)          # (C,)
    bias_c = (-mean * scale_c).astype(jnp.float32)     # (C,)

    # ---- choose the lane-dense slab ----------------------------------------
    R0, L0 = N * C, H * W
    use_alt = ((L0 % 128 != 0) or (R0 < 8)) and (W % 128 == 0)
    if use_alt:
        # (N*C*H, W): channel is constant per row (varies every H rows).
        R, L = N * C * H, W
        scale_col = jnp.tile(jnp.repeat(scale_c, H), N).reshape(R, 1)
        bias_col = jnp.tile(jnp.repeat(bias_c, H), N).reshape(R, 1)
    else:
        # (N*C, H*W): one row per (n, c) pair.
        R, L = R0, L0
        scale_col = jnp.tile(scale_c, N).reshape(R, 1)
        bias_col = jnp.tile(bias_c, N).reshape(R, 1)
    x2 = x.reshape(R, L)

    # ---- tile sizing from a per-generation byte budget ---------------------
    tile_bytes, vmem_limit = _tile_budget()
    TR = _choose_row_tile(R)
    TL = _choose_col_tile(L, TR, tile_bytes)

    # v7x has 2 TensorCores: don't let a large input collapse to a (1, 1) grid.
    kind = _device_kind()
    total_bytes = x2.size * x2.dtype.itemsize
    if ("v7" in kind and pl.cdiv(R, TR) == 1 and pl.cdiv(L, TL) == 1
            and L >= 256 and total_bytes >= (2 << 20)):
        TL = ((pl.cdiv(L, 2) + 127) // 128) * 128

    grid = (pl.cdiv(R, TR), pl.cdiv(L, TL))

    cp_kwargs = dict(dimension_semantics=("parallel", "parallel"))
    if vmem_limit is not None:
        cp_kwargs["vmem_limit_bytes"] = vmem_limit

    call_kwargs = {}
    if donate_input and x2.dtype == out_dtype:
        # Reuse x's HBM buffer for the output (caller must donate x).
        call_kwargs["input_output_aliases"] = {2: 0}

    # NOTE: grid order (rows outer, columns fastest-varying) + the (i, 0)
    # index_maps below keep the scale/bias blocks resident across the entire
    # inner column loop.  Do not reorder.
    out2 = pl.pallas_call(
        _normalize_kernel,
        out_shape=jax.ShapeDtypeStruct((R, L), out_dtype),
        grid=grid,
        in_specs=[
            pl.BlockSpec((TR, 1), lambda i, j: (i, 0)),    # scale column
            pl.BlockSpec((TR, 1), lambda i, j: (i, 0)),    # bias column
            pl.BlockSpec((TR, TL), lambda i, j: (i, j)),   # x tile (native dtype)
        ],
        out_specs=pl.BlockSpec((TR, TL), lambda i, j: (i, j)),
        compiler_params=pltpu.CompilerParams(**cp_kwargs),
        **call_kwargs,
    )(scale_col, bias_col, x2)

    return out2.reshape(N, C, H, W)


if __name__ == "__main__":
    key = jax.random.PRNGKey(0)
    # The module's reshape(1, 3, 1, 1) implies 3 channels.
    N, C, H, W = 2, 3, 16, 16
    x = jax.random.normal(key, (N, C, H, W), dtype=jnp.float32)

    # Deterministic buffer values (ImageNet-style stats).
    mean = jnp.array([0.485, 0.456, 0.406], dtype=jnp.float32)
    std = jnp.array([0.229, 0.224, 0.225], dtype=jnp.float32)

    # float32 path
    out = jax.block_until_ready(normalize(x, mean, std))
    ref = (x - mean.reshape(1, 3, 1, 1)) / std.reshape(1, 3, 1, 1)
    assert out.shape == (N, C, H, W)
    assert out.dtype == jnp.float32
    # mul-by-reciprocal vs exact divide differs by ~1 ulp; keep a tolerance.
    assert jnp.allclose(out, ref, atol=1e-5, rtol=1e-5)

    # bf16 input path (exercises the in-kernel cast; no extra upcast pass).
    x_bf = x.astype(jnp.bfloat16)
    out_bf = jax.block_until_ready(normalize(x_bf, mean, std))
    ref_bf = (x_bf.astype(jnp.float32) - mean.reshape(1, 3, 1, 1)) / std.reshape(1, 3, 1, 1)
    assert out_bf.dtype == jnp.float32
    assert jnp.allclose(out_bf, ref_bf, atol=1e-5, rtol=1e-5)

    print("KERNEL_OK")
</pallas_src>

<mosaic_0001>
module attributes {stable_mosaic.version = 11 : i64} {
  func.func @_normalize_kernel(%arg0: i32, %arg1: i32, %arg2: memref<6x1xf32, #tpu.memory_space<vmem>>, %arg3: memref<6x1xf32, #tpu.memory_space<vmem>>, %arg4: memref<6x256xf32, #tpu.memory_space<vmem>>, %arg5: memref<6x256xf32, #tpu.memory_space<vmem>>) attributes {dimension_semantics = [#tpu.dimension_semantics<parallel>, #tpu.dimension_semantics<parallel>], iteration_bounds = array<i64: 1, 1>, scalar_prefetch = 0 : i64, scratch_operands = 0 : i64, tpu.core_type = #tpu.core_type<tc>, window_params = [{transform_indices = @transform_0, window_bounds = array<i64: 6, 1>}, {transform_indices = @transform_1, window_bounds = array<i64: 6, 1>}, {transform_indices = @transform_2, window_bounds = array<i64: 6, 256>}, {transform_indices = @transform_3, window_bounds = array<i64: 6, 256>}]} {
    %c0 = arith.constant 0 : index
    %c0_0 = arith.constant 0 : index
    %0 = vector.load %arg4[%c0, %c0_0] : memref<6x256xf32, #tpu.memory_space<vmem>>, vector<6x256xf32>
    %c0_1 = arith.constant 0 : index
    %c0_2 = arith.constant 0 : index
    %1 = vector.load %arg2[%c0_1, %c0_2] : memref<6x1xf32, #tpu.memory_space<vmem>>, vector<6x1xf32>
    %2 = vector.broadcast %1 : vector<6x1xf32> to vector<6x256xf32>
    %3 = arith.mulf %0, %2 : vector<6x256xf32>
    %c0_3 = arith.constant 0 : index
    %c0_4 = arith.constant 0 : index
    %4 = vector.load %arg3[%c0_3, %c0_4] : memref<6x1xf32, #tpu.memory_space<vmem>>, vector<6x1xf32>
    %5 = vector.broadcast %4 : vector<6x1xf32> to vector<6x256xf32>
    %6 = arith.addf %3, %5 : vector<6x256xf32>
    %c0_5 = arith.constant 0 : index
    %c0_6 = arith.constant 0 : index
    %7 = vector.load %arg5[%c0_5, %c0_6] : memref<6x256xf32, #tpu.memory_space<vmem>>, vector<6x256xf32>
    tpu.vector_store %arg5[%c0_5, %c0_6], %6 {strides = array<i32>} : memref<6x256xf32, #tpu.memory_space<vmem>>, vector<6x256xf32>,
    return
  }
  func.func @transform_0(%arg0: i32, %arg1: i32) -> (i32, i32) {
    %c0_i32 = arith.constant 0 : i32
    %c0_i32_0 = arith.constant 0 : i32
    return %arg0, %c0_i32 : i32, i32
  }
  func.func @transform_1(%arg0: i32, %arg1: i32) -> (i32, i32) {
    %c0_i32 = arith.constant 0 : i32
    %c0_i32_0 = arith.constant 0 : i32
    return %arg0, %c0_i32 : i32, i32
  }
  func.func @transform_2(%arg0: i32, %arg1: i32) -> (i32, i32) {
    %c0_i32 = arith.constant 0 : i32
    return %arg0, %arg1 : i32, i32
  }
  func.func @transform_3(%arg0: i32, %arg1: i32) -> (i32, i32) {
    %c0_i32 = arith.constant 0 : i32
    return %arg0, %arg1 : i32, i32
  }
}

</mosaic_0001>

<bundles_post_ra>
// kernel: tpu_custom_call.1
= control target key start
LH: loop header
LB: loop body
LE: loop exit
PB: predicated region body
PF: predicated region fallthrough
CT: control target
= control target key end

     0   :  { %v76_v1 = vmov 0   ;;  %s122_s0 = inlined_call_operand.vmem [shape: f32[6,1], index: 0, kind: input, shape index: {}]   ;;  %s123_s1 = inlined_call_operand.vmem [shape: f32[6,1], index: 1, kind: input, shape index: {}]   ;;  %s124_s2 = inlined_call_operand.vmem [shape: f32[6,256], index: 2, kind: input, shape index: {}]   ;;  %s125_s3 = inlined_call_operand.hbm [shape: f32[6,256], index: 3, kind: output, shape index: {}]  }
   0x1   :  { %v17_v0 = vld [vmem:[%s122_s0] sm:$0x3f]  ;;  %51 = vset.pattern.permute.xlu0 %v76_v1 }
   0x2   :  { %8 = vsyncpa [#allocation3], 0  ;;  %20 = vperm.xlu0 %51, %v17_v0   ;;  %v25_v2 = vld [vmem:[%s123_s1] sm:$0x3f]  ;;  %v16_v5 = vld [vmem:[%s124_s2 + $0x8] sm:$0x3f] }
   0x3   :  { %v15_v4 = vld [vmem:[%s124_s2] sm:$0x3f]  ;;  %s77_s20 = smov [#allocation2]  }
   0x4   :  { %s41_s0 = sshll.u32 %s77_s20, 4  ;;  %s42_s0 = int_to_ptr.vmem [resolvable:$true] %s41_s0 }
   0x5   :  { %s52_s1 = scalar_lea.vmem %s42_s0, 256  ;;  %p57_p1 = scmp.lt.s32.totalorder %s42_s0, %s42_s0 }
   0x6   :  { %28 = vperm.xlu0 %51, %v25_v2   ;;  %p53_p0 = scmp.ne.s32.totalorder %s42_s0, %s52_s1  ;;  %p58_p2 = scmp.lt.s32.totalorder %s52_s1, %s52_s1 }
   0x8   :  { %p59_p3 = por %p58_p2, %p57_p1 }
   0xa   :  { %p60_p4 = pnand %p59_p3, %p53_p0 }
  0x81   :  { %v21_v3 = vpop.permute.xlu0 %20 }
  0x82   :  { %v23_v6 = vmul.f32 %v21_v3, %v15_v4  ;;  %v24_v7 = vmul.f32 %v21_v3, %v16_v5 }
  0x85   :  { %v29_v8 = vpop.permute.xlu0 %28 }
  0x86   :  { %v31_v9 = vadd.f32 %v29_v8, %v23_v6  ;;  %v32_v10 = vadd.f32 %v29_v8, %v24_v7 }
  0x88   :  { %33 = vst [vmem:[#allocation2] sm:$0x3f] %v31_v9  ;;  %34 = vst [vmem:[#allocation2 + $0x8] sm:$0x3f] %v32_v10 }
  0x89   :  { %63 = shalt.err (!%p60_p4)
}
  0x8a   :  { %s64_s2 = scalar_lea.hbm %s125_s3, 256 }
  0x8b   :  { %p65_p5 = scmp.ne.s32.totalorder %s125_s3, %s64_s2  ;;  %p68_p6 = scmp.lt.u32.totalorder %s64_s2, %s125_s3 }
  0x8d   :  { %p70_p7 = pnand %p68_p6, %p65_p5 }
  0x8f   :  { %73 = shalt.err (!%p70_p7)
}
  0x90   :  { %44 = dma.vmem_to_hbm [thread:$0]  %s42_s0, 256, %s125_s3, [#allocation3]  }
  0x91   :  { %74 = dma.done.wait [#allocation3], 256  }
  0x92   :  { %75 = vsyncadd [#allocation3], 4294967040 }
  0x93   :  { %48 = vsyncpa [#allocation3], 1 }

</bundles_post_ra>
